<compile_context>
chip_gen: v7x
topology: tpu7x:2x2x1
jax: 0.10.0
libtpu: 0.0.40
codegen_flags: <defaults>
</compile_context>

<pallas_src>
import functools
import math

import jax
import jax.numpy as jnp
from jax.experimental import pallas as pl
from jax.experimental.pallas import tpu as pltpu


def _mlp_residual_kernel(x_ref, w1_ref, b1_ref, w2_ref, b2_ref, *rest,
                         dropout_p, training):
    """One row-tile of Linear1 -> ReLU -> Linear2 -> inverted Dropout.

    x_ref:  (TM, E)   w1_ref: (E, H)   b1_ref: (1, H)
    w2_ref: (H, E)    b2_ref: (1, E)
    optional u_ref: (TM, E) uniform [0,1) randoms (training only)
    o_ref:  (TM, E)
    """
    apply_dropout = training and dropout_p > 0.0
    if apply_dropout:
        u_ref, o_ref = rest
    else:
        (o_ref,) = rest

    x = x_ref[...]
    # Linear1 + ReLU (MXU matmul, f32 accumulation); hidden never leaves VMEM.
    h = jnp.dot(x, w1_ref[...], preferred_element_type=jnp.float32) + b1_ref[...]
    h = jnp.maximum(h, 0.0)
    # Linear2.
    y = jnp.dot(h, w2_ref[...], preferred_element_type=jnp.float32) + b2_ref[...]

    if apply_dropout:
        # Inverted dropout: keep with prob (1-p), scale kept values by 1/(1-p).
        # TODO(synk): randomness cannot bit-match torch's RNG; semantics match.
        keep = u_ref[...] >= jnp.float32(dropout_p)
        scale = jnp.float32(1.0 / (1.0 - dropout_p))
        y = jnp.where(keep, y * scale, jnp.zeros_like(y))

    o_ref[...] = y.astype(o_ref.dtype)


def mlp_residual(x, w1_t, b1, w2_t, b2, *, dropout_p=0.0, training=False,
                 rng_key=None, block_rows=256):
    """x: (..., E) f32; w1_t: (E, H); b1: (H,); w2_t: (H, E); b2: (E,)."""
    orig_shape = x.shape
    E = orig_shape[-1]
    H = w1_t.shape[1]
    assert w1_t.shape == (E, H) and w2_t.shape == (H, E)
    assert b1.shape == (H,) and b2.shape == (E,)

    xm = x.reshape(-1, E)
    M = xm.shape[0]

    # Row tile: multiple of 8 (sublane granularity); pad rows so grid divides.
    tm = min(block_rows, ((M + 7) // 8) * 8)
    tm = max(8, ((tm + 7) // 8) * 8)
    m_pad = ((M + tm - 1) // tm) * tm
    if m_pad != M:
        xm = jnp.pad(xm, ((0, m_pad - M), (0, 0)))

    b1_2d = b1.reshape(1, H).astype(jnp.float32)
    b2_2d = b2.reshape(1, E).astype(jnp.float32)

    grid = (m_pad // tm,)
    apply_dropout = training and dropout_p > 0.0

    in_specs = [
        pl.BlockSpec((tm, E), lambda i: (i, 0)),   # x tile, pipelined over rows
        pl.BlockSpec((E, H), lambda i: (0, 0)),    # W1^T resident in VMEM
        pl.BlockSpec((1, H), lambda i: (0, 0)),    # b1 resident
        pl.BlockSpec((H, E), lambda i: (0, 0)),    # W2^T resident
        pl.BlockSpec((1, E), lambda i: (0, 0)),    # b2 resident
    ]
    operands = [xm.astype(jnp.float32), w1_t.astype(jnp.float32), b1_2d,
                w2_t.astype(jnp.float32), b2_2d]

    if apply_dropout:
        if rng_key is None:
            rng_key = jax.random.PRNGKey(0)
        # Per-row uniforms (unique per tile by construction, no seed reuse).
        u = jax.random.uniform(rng_key, (m_pad, E), dtype=jnp.float32)
        in_specs.append(pl.BlockSpec((tm, E), lambda i: (i, 0)))
        operands.append(u)

    kernel = functools.partial(
        _mlp_residual_kernel, dropout_p=float(dropout_p), training=bool(training)
    )

    flops = 2 * m_pad * E * H * 2  # two (m,E)x(E,H)-sized matmuls
    bytes_accessed = 4 * (m_pad * E * (3 if apply_dropout else 2)
                          + 2 * E * H + H + E)

    out = pl.pallas_call(
        kernel,
        out_shape=jax.ShapeDtypeStruct((m_pad, E), jnp.float32),
        grid=grid,
        in_specs=in_specs,
        out_specs=pl.BlockSpec((tm, E), lambda i: (i, 0)),
        compiler_params=pltpu.CompilerParams(
            dimension_semantics=("parallel",),
        ),
        cost_estimate=pl.CostEstimate(
            flops=flops, transcendentals=0, bytes_accessed=bytes_accessed),
    )(*operands)

    if m_pad != M:
        out = out[:M]
    return out.reshape(orig_shape)


if __name__ == "__main__":
    key = jax.random.PRNGKey(0)
    k_x, k_w1, k_b1, k_w2, k_b2, k_drop = jax.random.split(key, 6)

    embedding_size = 128          # multiple of 128 -> lane-dense stores
    forward_expansion = 4
    dropout = 0.1
    batch, seq = 2, 64
    hidden = embedding_size * forward_expansion

    x = jax.random.normal(k_x, (batch, seq, embedding_size), dtype=jnp.float32)

    # nn.Linear init: U(-1/sqrt(fan_in), 1/sqrt(fan_in)); store weights transposed.
    bound1 = 1.0 / math.sqrt(embedding_size)
    w1_t = jax.random.uniform(k_w1, (embedding_size, hidden),
                              minval=-bound1, maxval=bound1, dtype=jnp.float32)
    b1 = jax.random.uniform(k_b1, (hidden,), minval=-bound1, maxval=bound1,
                            dtype=jnp.float32)
    bound2 = 1.0 / math.sqrt(hidden)
    w2_t = jax.random.uniform(k_w2, (hidden, embedding_size),
                              minval=-bound2, maxval=bound2, dtype=jnp.float32)
    b2 = jax.random.uniform(k_b2, (embedding_size,), minval=-bound2, maxval=bound2,
                            dtype=jnp.float32)

    # Eval-mode forward (dropout identity) -- check against plain JAX reference.
    out_eval = mlp_residual(x, w1_t, b1, w2_t, b2, dropout_p=dropout,
                            training=False, block_rows=64)
    jax.block_until_ready(out_eval)
    ref = jnp.maximum(x.reshape(-1, embedding_size) @ w1_t + b1, 0.0) @ w2_t + b2
    ref = ref.reshape(x.shape)
    assert jnp.allclose(out_eval, ref, atol=1e-4, rtol=1e-4), "eval-mode mismatch"

    # Training-mode forward (dropout active) -- reproduce the exact keep-mask.
    out_train = mlp_residual(x, w1_t, b1, w2_t, b2, dropout_p=dropout,
                             training=True, rng_key=k_drop, block_rows=64)
    jax.block_until_ready(out_train)
    assert out_train.shape == x.shape
    u_ref = jax.random.uniform(k_drop, (batch * seq, embedding_size),
                               dtype=jnp.float32).reshape(x.shape)
    keep = u_ref >= dropout
    ref_train = jnp.where(keep, ref / (1.0 - dropout), 0.0)
    assert jnp.allclose(out_train, ref_train, atol=1e-4, rtol=1e-4), \
        "train-mode mismatch"

    print("KERNEL_OK")
</pallas_src>

<mosaic_0001>
module attributes {stable_mosaic.version = 11 : i64} {
  func.func @_mlp_residual_kernel(%arg0: i32, %arg1: memref<64x128xf32, #tpu.memory_space<vmem>>, %arg2: memref<128x512xf32, #tpu.memory_space<vmem>>, %arg3: memref<1x512xf32, #tpu.memory_space<vmem>>, %arg4: memref<512x128xf32, #tpu.memory_space<vmem>>, %arg5: memref<1x128xf32, #tpu.memory_space<vmem>>, %arg6: memref<64x128xf32, #tpu.memory_space<vmem>>) attributes {dimension_semantics = [#tpu.dimension_semantics<parallel>], iteration_bounds = array<i64: 2>, scalar_prefetch = 0 : i64, scratch_operands = 0 : i64, tpu.core_type = #tpu.core_type<tc>, window_params = [{transform_indices = @transform_0, window_bounds = array<i64: 64, 128>}, {pipeline_mode = #tpu.pipeline_mode<synchronous>, transform_indices = @transform_1, window_bounds = array<i64: 128, 512>}, {pipeline_mode = #tpu.pipeline_mode<synchronous>, transform_indices = @transform_2, window_bounds = array<i64: 1, 512>}, {pipeline_mode = #tpu.pipeline_mode<synchronous>, transform_indices = @transform_3, window_bounds = array<i64: 512, 128>}, {pipeline_mode = #tpu.pipeline_mode<synchronous>, transform_indices = @transform_4, window_bounds = array<i64: 1, 128>}, {transform_indices = @transform_5, window_bounds = array<i64: 64, 128>}]} {
    %c0 = arith.constant 0 : index
    %c0_0 = arith.constant 0 : index
    %0 = vector.load %arg1[%c0, %c0_0] : memref<64x128xf32, #tpu.memory_space<vmem>>, vector<64x128xf32>
    %c0_1 = arith.constant 0 : index
    %c0_2 = arith.constant 0 : index
    %1 = vector.load %arg2[%c0_1, %c0_2] : memref<128x512xf32, #tpu.memory_space<vmem>>, vector<128x512xf32>
    %cst = arith.constant dense<0.000000e+00> : vector<64x512xf32>
    %2 = tpu.matmul %0, %1, %cst {dimension_numbers = #tpu.dot_dimension_numbers<[1], [0], [0], [1], [0, 0, 1, 1], [], []>} : vector<64x128xf32>, vector<128x512xf32>, vector<64x512xf32> -> vector<64x512xf32>
    %c0_3 = arith.constant 0 : index
    %c0_4 = arith.constant 0 : index
    %3 = vector.load %arg3[%c0_3, %c0_4] : memref<1x512xf32, #tpu.memory_space<vmem>>, vector<1x512xf32>
    %4 = vector.broadcast %3 : vector<1x512xf32> to vector<64x512xf32>
    %5 = arith.addf %2, %4 : vector<64x512xf32>
    %cst_5 = arith.constant 0.000000e+00 : f32
    %6 = vector.broadcast %cst_5 : f32 to vector<64x512xf32>
    %7 = arith.maximumf %5, %6 : vector<64x512xf32>
    %c0_6 = arith.constant 0 : index
    %c0_7 = arith.constant 0 : index
    %8 = vector.load %arg4[%c0_6, %c0_7] : memref<512x128xf32, #tpu.memory_space<vmem>>, vector<512x128xf32>
    %cst_8 = arith.constant dense<0.000000e+00> : vector<64x128xf32>
    %9 = tpu.matmul %7, %8, %cst_8 {dimension_numbers = #tpu.dot_dimension_numbers<[1], [0], [0], [1], [0, 0, 1, 1], [], []>} : vector<64x512xf32>, vector<512x128xf32>, vector<64x128xf32> -> vector<64x128xf32>
    %c0_9 = arith.constant 0 : index
    %c0_10 = arith.constant 0 : index
    %10 = vector.load %arg5[%c0_9, %c0_10] : memref<1x128xf32, #tpu.memory_space<vmem>>, vector<1x128xf32>
    %11 = vector.broadcast %10 : vector<1x128xf32> to vector<64x128xf32>
    %12 = arith.addf %9, %11 : vector<64x128xf32>
    %c0_11 = arith.constant 0 : index
    %c0_12 = arith.constant 0 : index
    %13 = vector.load %arg6[%c0_11, %c0_12] : memref<64x128xf32, #tpu.memory_space<vmem>>, vector<64x128xf32>
    tpu.vector_store %arg6[%c0_11, %c0_12], %12 {strides = array<i32>} : memref<64x128xf32, #tpu.memory_space<vmem>>, vector<64x128xf32>,
    return
  }
  func.func @transform_0(%arg0: i32) -> (i32, i32) {
    %c0_i32 = arith.constant 0 : i32
    %c0_i32_0 = arith.constant 0 : i32
    return %arg0, %c0_i32 : i32, i32
  }
  func.func @transform_1(%arg0: i32) -> (i32, i32) {
    %c0_i32 = arith.constant 0 : i32
    %c0_i32_0 = arith.constant 0 : i32
    %c0_i32_1 = arith.constant 0 : i32
    return %c0_i32, %c0_i32_0 : i32, i32
  }
  func.func @transform_2(%arg0: i32) -> (i32, i32) {
    %c0_i32 = arith.constant 0 : i32
    %c0_i32_0 = arith.constant 0 : i32
    %c0_i32_1 = arith.constant 0 : i32
    return %c0_i32, %c0_i32_0 : i32, i32
  }
  func.func @transform_3(%arg0: i32) -> (i32, i32) {
    %c0_i32 = arith.constant 0 : i32
    %c0_i32_0 = arith.constant 0 : i32
    %c0_i32_1 = arith.constant 0 : i32
    return %c0_i32, %c0_i32_0 : i32, i32
  }
  func.func @transform_4(%arg0: i32) -> (i32, i32) {
    %c0_i32 = arith.constant 0 : i32
    %c0_i32_0 = arith.constant 0 : i32
    %c0_i32_1 = arith.constant 0 : i32
    return %c0_i32, %c0_i32_0 : i32, i32
  }
  func.func @transform_5(%arg0: i32) -> (i32, i32) {
    %c0_i32 = arith.constant 0 : i32
    %c0_i32_0 = arith.constant 0 : i32
    return %arg0, %c0_i32 : i32, i32
  }
}

</mosaic_0001>

<bundles_post_ra>
// kernel: tpu_custom_call.1
= control target key start
LH: loop header
LB: loop body
LE: loop exit
PB: predicated region body
PF: predicated region fallthrough
CT: control target
= control target key end

     0   :  { %10 = vsyncpa [#allocation3], 0  ;;  %s1892_s0 = inlined_call_operand.hbm [shape: f32[128,128], index: 0, kind: input, shape index: {}]   ;;  %s1893_s1 = inlined_call_operand.hbm [shape: f32[128,512], index: 1, kind: input, shape index: {}]   ;;  %s1894_s2 = inlined_call_operand.vmem [shape: f32[1,512], index: 2, kind: input, shape index: {}]   ;;  %s1895_s3 = inlined_call_operand.hbm [shape: f32[512,128], index: 3, kind: input, shape index: {}]   ;;  %s1896_s4 = inlined_call_operand.vmem [shape: f32[1,128], index: 4, kind: input, shape index: {}]   ;;  %s1897_s5 = inlined_call_operand.hbm [shape: f32[128,128], index: 5, kind: output, shape index: {}]  }
   0x1   :  { %12 = vsyncpa [#allocation3 + $0x1], 0 }
   0x2   :  { %13 = vsyncpa [#allocation6], 0 }
   0x3   :  { %14 = vsyncpa [#allocation4], 0 }
   0x4   :  { %16 = vsyncpa [#allocation4 + $0x1], 0  ;;  %s1555_s18 = smov 0   ;;  %s1557_s19 = smov 0  }
   0x5   :  { %s1559_s20 = smov 0   ;;  %s1561_s21 = smov 0  }
   0x6 LB: > { %s1576_s22 = sadd.s32 4294967295, %s1512_s21   ;;  %s1021_s23 = sadd.s32 4294967294, %s1512_s21   ;;  %s1512_s21 = sphi %s1561_s21, %s1917_s21   ;;  %s1508_s20 = sphi %s1559_s20, %s1916_s20   ;;  %s1504_s19 = sphi %s1557_s19, %s1915_s19   ;;  %s1500_s18 = sphi %s1555_s18, %s1914_s18  }
   0x7   : > { %p42_p0 = scmp.ne.s32.totalorder %s1504_s19, %s1500_s18  ;;  %p1898_p1 = scmp.eq.s32.totalorder %s1576_s22, 0 }
   0x8   : > { %p156_p3 = scmp.eq.s32.totalorder %s1021_s23, 1  ;;  %p1022_p5 = scmp.ge.s32.totalorder %s1512_s21, 1 }
   0x9   : > { %p1585_p4 = por %p1898_p1, %p42_p0  ;;  %p163_p7 = scmp.lt.s32.totalorder %s1512_s21, 3 }
   0xa   : > { %p1590_p6 = por %p156_p3, %p42_p0  ;;  %s1514_s27 = smov [#allocation5]  }
   0xb   : > { %s1901_s24 = scalar_select %p1585_p4, 1, 0 }
   0xc   : > { %s1902_s25 = scalar_select %p1590_p6, 1, 0 }
   0xd   : > { %p1595_p8 = pnand %p1022_p5, %p163_p7  ;;  %s175_s28 = sshll.u32 %s1514_s27, 4  ;;  %s1599_s28 = int_to_ptr.vmem [resolvable:$true] %s175_s28 }
   0xe   : > { %s1515_s30 = smov [#allocation7]   ;;  %s1356_s9 = scalar_lea.hbm %s1893_s1, 8192 }
   0xf   : > { %p1294_p9 = pneg %p1595_p8  ;;  %s191_s6 = sshll.u32 %s1515_s30, 4  ;;  %s1610_s6 = int_to_ptr.vmem [resolvable:$true] %s191_s6 }
  0x10   : > { %p1357_p12 = scmp.ne.s32.totalorder %s1893_s1, %s1356_s9  ;;  %p1363_p5 = scmp.lt.u32.totalorder %s1356_s9, %s1893_s1 }
  0x11   : > { %p1606_p11 = pnand %p1294_p9, %p1898_p1 }
  0x13   : > { %p1358_p13 = pneg %p1606_p11 }
  0x15   : > { %p1359_p0 = pnand %p1358_p13, %p1357_p12 }
  0x17   : > { %p1360_p3 = pneg %p1359_p0 }
  0x19   : > { %p1365_p7 = pnand %p1363_p5, %p1360_p3 }
  0x1b   : > { %1368 = shalt.err (!%p1365_p7)
}
  0x1c   : > { %s1369_s14 = scalar_lea.vmem %s1599_s28, 8192  ;;  %p1377_p2 = scmp.lt.s32.totalorder %s1599_s28, %s1599_s28 }
  0x1d   : > { %p1370_p9 = scmp.ne.s32.totalorder %s1599_s28, %s1369_s14  ;;  %p1378_p12 = scmp.lt.s32.totalorder %s1369_s14, %s1369_s14 }
  0x1f   : > { %p1372_p10 = pnand %p1370_p9, %p1358_p13  ;;  %p1379_p0 = por %p1378_p12, %p1377_p2 }
  0x21   : > { %p1373_p1 = pneg %p1372_p10 }
  0x23   : > { %p1380_p6 = pnand %p1379_p0, %p1373_p1 }
  0x25   : > { %1383 = shalt.err (!%p1380_p6)
}
  0x26   : > { %s1516_s15 = smov 512   ;;  %s1517_s16 = smov 32  }
  0x27   : > { %1297 = dma.hbm_to_vmem [thread:$0]  (!%p1606_p11), %s1893_s1, 8192, %s1599_s28, [#allocation6], %s1516_s15, %s1516_s15, %s1517_s16  }
  0x28   : > { %s1384_s7 = scalar_lea.hbm %s1895_s3, 8192 }
  0x29   : > { %p1385_p2 = scmp.ne.s32.totalorder %s1895_s3, %s1384_s7  ;;  %p1391_p10 = scmp.lt.u32.totalorder %s1384_s7, %s1895_s3 }
  0x2b   : > { %p1387_p1 = pnand %p1385_p2, %p1358_p13 }
  0x2d   : > { %p1388_p6 = pneg %p1387_p1 }
  0x2f   : > { %p1393_p3 = pnand %p1391_p10, %p1388_p6 }
  0x31   : > { %1396 = shalt.err (!%p1393_p3)
}
  0x32   : > { %s1397_s28 = scalar_lea.vmem %s1610_s6, 8192  ;;  %p1405_p12 = scmp.lt.s32.totalorder %s1610_s6, %s1610_s6 }
  0x33   : > { %p1398_p5 = scmp.ne.s32.totalorder %s1610_s6, %s1397_s28  ;;  %p1406_p0 = scmp.lt.s32.totalorder %s1397_s28, %s1397_s28 }
  0x35   : > { %p1400_p7 = pnand %p1398_p5, %p1358_p13  ;;  %p1407_p2 = por %p1406_p0, %p1405_p12 }
  0x37   : > { %p1401_p9 = pneg %p1400_p7 }
  0x39   : > { %p1408_p1 = pnand %p1407_p2, %p1401_p9 }
  0x3b   : > { %1411 = shalt.err (!%p1408_p1)
}
  0x3c   : > { %s1518_s12 = smov 128   ;;  %s1519_s13 = smov 8  }
  0x3d   : > { %1300 = dma.hbm_to_vmem [thread:$0]  (!%p1606_p11), %s1895_s3, 8192, %s1610_s6, [#allocation6], %s1518_s12, %s1518_s12, %s1519_s13  }
  0x3e   : > { %s1668_s16 = sadd.s32 1, %s1512_s21   ;;  %s29_s23 = sadd.s32 1, %s1508_s20 }
  0x3f   : > { %s26_s17 = ssub.s32 %s1512_s21, %s1668_s16  ;;  %p36_p6 = scmp.ne.s32.totalorder %s1508_s20, %s1504_s19 }
  0x40   : > { %p27_p13 = scmp.eq.s32.totalorder %s26_s17, 0  ;;  %p37_p10 = scmp.eq.s32.totalorder %s1512_s21, 0 }
  0x41   : > { %p1905_p5 = scmp.eq.s32.totalorder %s1576_s22, 1  ;;  %p1311_p9 = scmp.lt.s32.totalorder %s1512_s21, 2 }
  0x42   : > { %s1677_s27 = scalar_select %p27_p13, %s1508_s20, %s29_s23  }
  0x43   : > { %p38_p3 = por %p37_p10, %p36_p6  ;;  %p1681_p7 = por %p1905_p5, %p36_p6 }
  0x44   : > { %s208_s30 = sand.u32 1, %s1508_s20   ;;  %s1040_s6 = sshll.u32 %s1512_s21, 10 }
  0x45   : > { %s1906_s29 = scalar_select %p1681_p7, 1, 0 }
  0x46   : > { %s1026_s7 = sshll.u32 %s208_s30, 6  ;;  %s1691_s10 = scalar_lea.hbm %s1892_s0, %s1040_s6 }
  0x47   : > { %s212_s11 = scalar_lea.vmem [#allocation2], %s1026_s7  ;;  %p1695_p11 = pnand %p1311_p9, %p38_p3 }
  0x48   : > { %s219_s28 = sshll.u32 %s212_s11, 4  ;;  %s1699_s15 = scalar_lea.sflag [#allocation3], %s208_s30  ;;  %s1693_s28 = int_to_ptr.vmem [resolvable:$true] %s219_s28 }
  0x49   : > { %s1412_s17 = scalar_lea.hbm %s1691_s10, 1024  ;;  %p1414_p0 = pneg %p1695_p11 }
  0x4a   : > { %p1413_p12 = scmp.ne.s32.totalorder %s1691_s10, %s1412_s17  ;;  %s1417_s6 = scalar_lea.hbm %s1892_s0, 2048 }
  0x4b   : > { %p1418_p13 = scmp.lt.u32.totalorder %s1691_s10, %s1892_s0  ;;  %p1419_p6 = scmp.lt.u32.totalorder %s1417_s6, %s1412_s17 }
  0x4c   : > { %p1415_p2 = pnand %p1414_p0, %p1413_p12  ;;  %p1421_p3 = scmp.lt.u32.totalorder %s1412_s17, %s1691_s10 }
  0x4d   : > { %p1420_p10 = por %p1419_p6, %p1418_p13 }
  0x4e   : > { %p1416_p1 = pneg %p1415_p2 }
  0x4f   : > { %p1422_p5 = por %p1421_p3, %p1420_p10 }
  0x51   : > { %p1423_p9 = pnand %p1422_p5, %p1416_p1 }
  0x53   : > { %1426 = shalt.err (!%p1423_p9)
}
  0x54   : > { %s1427_s30 = scalar_lea.vmem %s1693_s28, 1024  ;;  %s1520_s11 = smov [#allocation2]  }
  0x55   : > { %p1428_p12 = scmp.ne.s32.totalorder %s1693_s28, %s1427_s30  ;;  %s1432_s23 = sshll.u32 %s1520_s11, 4  ;;  %s1433_s23 = int_to_ptr.vmem [resolvable:$false] %s1432_s23 }
  0x56   : > { %s1434_s7 = scalar_lea.vmem %s1433_s23, 2048  ;;  %p1435_p4 = scmp.lt.s32.totalorder %s1693_s28, %s1433_s23 }
  0x57   : > { %p1430_p2 = pnand %p1428_p12, %p1414_p0  ;;  %p1436_p13 = scmp.lt.s32.totalorder %s1434_s7, %s1427_s30 }
  0x59   : > { %p1431_p7 = pneg %p1430_p2  ;;  %p1437_p6 = por %p1436_p13, %p1435_p4 }
  0x5b   : > { %p1438_p10 = pnand %p1437_p6, %p1431_p7 }
  0x5d   : > { %1441 = shalt.err (!%p1438_p10)
}
  0x5e   : > { %1304 = dma.hbm_to_vmem [thread:$0]  (!%p1695_p11), %s1691_s10, 1024, %s1693_s28, %s1699_s15, %s1518_s12, %s1518_s12, %s1519_s13  }
  0x5f   : > { %231 = sbr.rel (%p1595_p8) target bundleno = 622 (0x26e), region = 40  ;;  %s1733_s17 = sand.u32 (!%p1595_p8), 1, %s1504_s19  }
  0x60   : > { %s1030_s6 = sshll.u32 (!%p1595_p8), %s1733_s17, 6  ;;  %s234_s8 = scalar_lea.sflag (!%p1595_p8), [#allocation3], %s1733_s17 }
  0x61   : > { %s1739_s14 = scalar_lea.vmem (!%p1595_p8), [#allocation2], %s1030_s6  ;;  %p1908_p4 = scmp.ne.s32.totalorder (!%p1595_p8), %s1901_s24, 0 }
  0x66   : > { %1487 = dma.done.wait (%p1908_p4), %s234_s8, 1024  }
  0x67   : > { %1489 = vsyncadd (%p1908_p4), %s234_s8, 4294966272  ;;  %p1909_p7 = scmp.eq.s32.totalorder %s1576_s22, 0 }
  0x69   : > { %1491 = dma.done.wait (%p1909_p7), [#allocation6], 16384   ;;  %p1910_p8 = pmov %p1909_p7 }
  0x6a   : > { %v1521_v0 = vmov 0.0   ;;  %v283_v1 = vld [vmem:[#allocation5 + $0x8] sm:$0xff]  ;;  %v285_v3 = vld [vmem:[#allocation5 + $0x18] sm:$0xff]  ;;  %v282_v6 = vld [vmem:[#allocation5] sm:$0xff]  ;;  %s1824_s10 = scalar_lea.vmem [#allocation8], %s1030_s6  ;;  %s1041_s15 = sshll.u32 %s1576_s22, 10 }
  0x6b   : > { %1493 = vsyncadd (%p1910_p8), [#allocation6], 4294950912  ;;  %432 = vmatprep.mubr.f32.mxu0 %v1521_v0  ;;  %545 = vmatprep.mubr.f32.mxu1 %v1521_v0  ;;  %v287_v2 = vld [vmem:[#allocation5 + $0x28] sm:$0xff]  ;;  %v289_v5 = vld [vmem:[#allocation5 + $0x38] sm:$0xff]  ;;  %s929_s28 = sshll.u32 %s1824_s10, 4  ;;  %s1847_s11 = scalar_lea.hbm %s1897_s5, %s1041_s15  ;;  %s1840_s28 = int_to_ptr.vmem [resolvable:$true] %s929_s28 }
  0x6c   : > { %v1154_v4 = vpack.c.bf16 %v287_v2, %v283_v1  ;;  %v286_v7 = vld [vmem:[#allocation5 + $0x20] sm:$0xff]  ;;  %v1186_v8 = vpack.c.bf16 %v289_v5, %v285_v3  ;;  %v284_v10 = vld [vmem:[#allocation5 + $0x10] sm:$0xff]  ;;  %v291_v12 = vld [vmem:[#allocation5 + $0x48] sm:$0xff]  ;;  %s916_s23 = scalar_lea.sflag [#allocation4], %s1733_s17  ;;  %s1442_s7 = scalar_lea.vmem %s1840_s28, 1024 }
  0x6d   : > { %v1156_v9 = vpack.c.bf16 %v286_v7, %v282_v6  ;;  %v288_v11 = vld [vmem:[#allocation5 + $0x30] sm:$0xff]  ;;  %v295_v14 = vld [vmem:[#allocation5 + $0x68] sm:$0xff]  ;;  %v293_v15 = vld [vmem:[#allocation5 + $0x58] sm:$0xff]  ;;  %p1443_p11 = scmp.ne.s32.totalorder %s1840_s28, %s1442_s7  ;;  %p1911_p0 = scmp.ne.s32.totalorder %s1906_s29, 0 }
  0x6e   : > { %1155 = vmatprep.subr.bf16.mxu0 %v1154_v4  ;;  %v1188_v13 = vpack.c.bf16 %v288_v11, %v284_v10  ;;  %v297_v16 = vld [vmem:[#allocation5 + $0x78] sm:$0xff]  ;;  %1187 = vmatprep.subr.bf16.mxu1 %v1186_v8  ;;  %v1158_v17 = vpack.c.bf16 %v295_v14, %v291_v12  ;;  %v290_v19 = vld [vmem:[#allocation5 + $0x40] sm:$0xff]  ;;  %v292_v21 = vld [vmem:[#allocation5 + $0x50] sm:$0xff]  ;;  %s1522_s22 = smov [#allocation8]  }
  0x6f   : > { %1157 = vmatpush1.bf16.msra.mxu0 %v1156_v9  ;;  %v1190_v18 = vpack.c.bf16 %v297_v16, %v293_v15  ;;  %v294_v20 = vld [vmem:[#allocation5 + $0x60] sm:$0xff]  ;;  %v296_v23 = vld [vmem:[#allocation5 + $0x70] sm:$0xff]  ;;  %v299_v24 = vld [vmem:[#allocation5 + $0x88] sm:$0xff]  ;;  %p1444_p1 = pnand %p1443_p11, %p1911_p0  ;;  %s1446_s6 = sshll.u32 %s1522_s22, 4  ;;  %s1447_s6 = int_to_ptr.vmem [resolvable:$false] %s1446_s6 }
  0x70   : > { %1189 = vmatpush1.bf16.msra.mxu1 %v1188_v13  ;;  %v1160_v22 = vpack.c.bf16 %v294_v20, %v290_v19  ;;  %v303_v25 = vld [vmem:[#allocation5 + $0xa8] sm:$0xff]  ;;  %1159 = vmatprep.subr.bf16.mxu0 %v1158_v17  ;;  %v1192_v26 = vpack.c.bf16 %v296_v23, %v292_v21  ;;  %v301_v28 = vld [vmem:[#allocation5 + $0x98] sm:$0xff]  ;;  %v298_v30 = vld [vmem:[#allocation5 + $0x80] sm:$0xff]  ;;  %s1448_s8 = scalar_lea.vmem %s1447_s6, 2048  ;;  %p1449_p5 = scmp.lt.s32.totalorder %s1840_s28, %s1447_s6 }
  0x71   : > { %1191 = vmatprep.subr.bf16.mxu1 %v1190_v18  ;;  %v1162_v27 = vpack.c.bf16 %v303_v25, %v299_v24  ;;  %v305_v29 = vld [vmem:[#allocation5 + $0xb8] sm:$0xff]  ;;  %v302_v32 = vld [vmem:[#allocation5 + $0xa0] sm:$0xff]  ;;  %v300_v33 = vld [vmem:[#allocation5 + $0x90] sm:$0xff]  ;;  %p1445_p3 = pneg %p1444_p1  ;;  %p1450_p9 = scmp.lt.s32.totalorder %s1448_s8, %s1442_s7 }
  0x72   : > { %v1194_v31 = vpack.c.bf16 %v305_v29, %v301_v28  ;;  %v304_v34 = vld [vmem:[#allocation5 + $0xb0] sm:$0xff]  ;;  %v1164_v35 = vpack.c.bf16 %v302_v32, %v298_v30  ;;  %v307_v36 = vld [vmem:[#allocation5 + $0xc8] sm:$0xff]  ;;  %v309_v38 = vld [vmem:[#allocation5 + $0xd8] sm:$0xff] }
  0x73   : > { %1161 = vmatpush1.bf16.msra.mxu0 %v1160_v22  ;;  %v311_v37 = vld [vmem:[#allocation5 + $0xe8] sm:$0xff]  ;;  %v1196_v39 = vpack.c.bf16 %v304_v34, %v300_v33  ;;  %v313_v41 = vld [vmem:[#allocation5 + $0xf8] sm:$0xff]  ;;  %v306_v42 = vld [vmem:[#allocation5 + $0xc0] sm:$0xff]  ;;  %p1451_p12 = por %p1450_p9, %p1449_p5 }
  0x74   : > { %1193 = vmatpush1.bf16.msra.mxu1 %v1192_v26  ;;  %1163 = vmatprep.subr.bf16.mxu0 %v1162_v27  ;;  %v1166_v40 = vpack.c.bf16 %v311_v37, %v307_v36  ;;  %v310_v43 = vld [vmem:[#allocation5 + $0xe0] sm:$0xff]  ;;  %v1198_v44 = vpack.c.bf16 %v313_v41, %v309_v38  ;;  %v308_v45 = vld [vmem:[#allocation5 + $0xd0] sm:$0xff]  ;;  %v315_v47 = vld [vmem:[#allocation5 + $0x108] sm:$0xff] }
  0x75   : > { %1195 = vmatprep.subr.bf16.mxu1 %v1194_v31  ;;  %v312_v46 = vld [vmem:[#allocation5 + $0xf0] sm:$0xff]  ;;  %v319_v48 = vld [vmem:[#allocation5 + $0x128] sm:$0xff]  ;;  %v317_v49 = vld [vmem:[#allocation5 + $0x118] sm:$0xff]  ;;  %v1168_v51 = vpack.c.bf16 %v310_v43, %v306_v42  ;;  %p1452_p2 = pnand %p1451_p12, %p1445_p3 }
  0x76   : > { %v321_v50 = vld [vmem:[#allocation5 + $0x138] sm:$0xff]  ;;  %v1200_v52 = vpack.c.bf16 %v312_v46, %v308_v45  ;;  %v1170_v53 = vpack.c.bf16 %v319_v48, %v315_v47  ;;  %v314_v54 = vld [vmem:[#allocation5 + $0x100] sm:$0xff]  ;;  %v316_v56 = vld [vmem:[#allocation5 + $0x110] sm:$0xff] }
  0x77   : > { %1165 = vmatpush1.bf16.msra.mxu0 %v1164_v35  ;;  %v318_v55 = vld [vmem:[#allocation5 + $0x120] sm:$0xff]  ;;  %v1202_v57 = vpack.c.bf16 %v321_v50, %v317_v49  ;;  %v320_v58 = vld [vmem:[#allocation5 + $0x130] sm:$0xff]  ;;  %v323_v59 = vld [vmem:[#allocation5 + $0x148] sm:$0xff] }
  0x78   : > { %1197 = vmatpush1.bf16.msra.mxu1 %v1196_v39  ;;  %1167 = vmatprep.subr.bf16.mxu0 %v1166_v40  ;;  %v327_v60 = vld [vmem:[#allocation5 + $0x168] sm:$0xff]  ;;  %v325_v61 = vld [vmem:[#allocation5 + $0x158] sm:$0xff]  ;;  %v1172_v63 = vpack.c.bf16 %v318_v55, %v314_v54  ;;  %v1204_v1 = vpack.c.bf16 %v320_v58, %v316_v56  ;;  %v322_v3 = vld [vmem:[#allocation5 + $0x140] sm:$0xff] }
  0x79   : > { %1199 = vmatprep.subr.bf16.mxu1 %v1198_v44  ;;  %v329_v62 = vld [vmem:[#allocation5 + $0x178] sm:$0xff]  ;;  %v1174_v2 = vpack.c.bf16 %v327_v60, %v323_v59  ;;  %v326_v4 = vld [vmem:[#allocation5 + $0x160] sm:$0xff]  ;;  %v324_v5 = vld [vmem:[#allocation5 + $0x150] sm:$0xff] }
  0x7a   : > { %v1206_v6 = vpack.c.bf16 %v329_v62, %v325_v61  ;;  %v328_v7 = vld [vmem:[#allocation5 + $0x170] sm:$0xff]  ;;  %v331_v8 = vld [vmem:[#allocation5 + $0x188] sm:$0xff]  ;;  %v333_v10 = vld [vmem:[#allocation5 + $0x198] sm:$0xff]  ;;  %v1176_v12 = vpack.c.bf16 %v326_v4, %v322_v3 }
  0x7b   : > { %1169 = vmatpush1.bf16.msra.mxu0 %v1168_v51  ;;  %v335_v9 = vld [vmem:[#allocation5 + $0x1a8] sm:$0xff]  ;;  %v337_v11 = vld [vmem:[#allocation5 + $0x1b8] sm:$0xff]  ;;  %v1208_v13 = vpack.c.bf16 %v328_v7, %v324_v5  ;;  %v330_v15 = vld [vmem:[#allocation5 + $0x180] sm:$0xff] }
  0x7c   : > { %1201 = vmatpush1.bf16.msra.mxu1 %v1200_v52  ;;  %1171 = vmatprep.subr.bf16.mxu0 %v1170_v53  ;;  %v1178_v14 = vpack.c.bf16 %v335_v9, %v331_v8  ;;  %v334_v16 = vld [vmem:[#allocation5 + $0x1a0] sm:$0xff]  ;;  %v332_v17 = vld [vmem:[#allocation5 + $0x190] sm:$0xff]  ;;  %v1210_v18 = vpack.c.bf16 %v337_v11, %v333_v10  ;;  %v339_v20 = vld [vmem:[#allocation5 + $0x1c8] sm:$0xff] }
  0x7d   : > { %1203 = vmatprep.subr.bf16.mxu1 %v1202_v57  ;;  %v336_v19 = vld [vmem:[#allocation5 + $0x1b0] sm:$0xff]  ;;  %v343_v21 = vld [vmem:[#allocation5 + $0x1e8] sm:$0xff]  ;;  %v341_v22 = vld [vmem:[#allocation5 + $0x1d8] sm:$0xff]  ;;  %v1180_v24 = vpack.c.bf16 %v334_v16, %v330_v15 }
  0x7e   : > { %v345_v23 = vld [vmem:[#allocation5 + $0x1f8] sm:$0xff]  ;;  %v1212_v25 = vpack.c.bf16 %v336_v19, %v332_v17  ;;  %v1182_v26 = vpack.c.bf16 %v343_v21, %v339_v20  ;;  %v338_v27 = vld [vmem:[#allocation5 + $0x1c0] sm:$0xff]  ;;  %v340_v29 = vld [vmem:[#allocation5 + $0x1d0] sm:$0xff] }
  0x7f   : > { %1173 = vmatpush1.bf16.msra.mxu0 %v1172_v63  ;;  %v342_v28 = vld [vmem:[#allocation5 + $0x1e0] sm:$0xff]  ;;  %v1214_v30 = vpack.c.bf16 %v345_v23, %v341_v22  ;;  %v344_v31 = vld [vmem:[#allocation5 + $0x1f0] sm:$0xff]  ;;  %v643_v33 = vld [vmem:[#allocation7 + $0x88] sm:$0xff] }
  0x80   : > { %1205 = vmatpush1.bf16.msra.mxu1 %v1204_v1  ;;  %1175 = vmatprep.subr.bf16.mxu0 %v1174_v2  ;;  %v642_v32 = vld [vmem:[#allocation7 + $0x80] sm:$0xff]  ;;  %v675_v35 = vld [vmem:[#allocation7 + $0x188] sm:$0xff]  ;;  %v1184_v36 = vpack.c.bf16 %v342_v28, %v338_v27  ;;  %v1216_v37 = vpack.c.bf16 %v344_v31, %v340_v29  ;;  %v644_v44 = vld [vmem:[#allocation7 + $0x90] sm:$0xff] }
  0x81   : > { %1207 = vmatprep.subr.bf16.mxu1 %v1206_v6  ;;  %v674_v34 = vld [vmem:[#allocation7 + $0x180] sm:$0xff]  ;;  %v1218_v38 = vpack.c.bf16 %v643_v33, %v642_v32  ;;  %v627_v40 = vld [vmem:[#allocation7 + $0x8] sm:$0xff]  ;;  %v645_v45 = vld [vmem:[#allocation7 + $0x98] sm:$0xff] }
  0x82   : > { %v626_v39 = vld [vmem:[#allocation7] sm:$0xff]  ;;  %v1250_v41 = vpack.c.bf16 %v675_v35, %v674_v34  ;;  %v659_v43 = vld [vmem:[#allocation7 + $0x108] sm:$0xff]  ;;  %v676_v47 = vld [vmem:[#allocation7 + $0x190] sm:$0xff]  ;;  %v1222_v51 = vpack.c.bf16 %v645_v45, %v644_v44 }
  0x83   : > { %1177 = vmatpush1.bf16.msra.mxu0 %v1176_v12  ;;  %v658_v42 = vld [vmem:[#allocation7 + $0x100] sm:$0xff]  ;;  %v677_v48 = vld [vmem:[#allocation7 + $0x198] sm:$0xff]  ;;  %v1220_v49 = vpack.c.bf16 %v627_v40, %v626_v39  ;;  %v628_v52 = vld [vmem:[#allocation7 + $0x10] sm:$0xff] }
  0x84   : > { %1209 = vmatpush1.bf16.msra.mxu1 %v1208_v13  ;;  %1179 = vmatprep.subr.bf16.mxu0 %v1178_v14  ;;  %v274_v46 = vld [vmem:[%s1739_s14] sm:$0xff]  ;;  %v1252_v50 = vpack.c.bf16 %v659_v43, %v658_v42  ;;  %v629_v53 = vld [vmem:[#allocation7 + $0x18] sm:$0xff]  ;;  %v660_v54 = vld [vmem:[#allocation7 + $0x110] sm:$0xff]  ;;  %v1254_v55 = vpack.c.bf16 %v677_v48, %v676_v47 }
  0x85   : > { %1211 = vmatprep.subr.bf16.mxu1 %v1210_v18  ;;  %v661_v56 = vld [vmem:[#allocation7 + $0x118] sm:$0xff]  ;;  %v646_v57 = vld [vmem:[#allocation7 + $0xa0] sm:$0xff]  ;;  %v647_v58 = vld [vmem:[#allocation7 + $0xa8] sm:$0xff]  ;;  %v1224_v62 = vpack.c.bf16 %v629_v53, %v628_v52 }
  0x86   : > { %v275_v59 = vld [vmem:[%s1739_s14 + $0x8] sm:$0xff]  ;;  %v678_v60 = vld [vmem:[#allocation7 + $0x1a0] sm:$0xff]  ;;  %v1256_v63 = vpack.c.bf16 %v661_v56, %v660_v54  ;;  %v1226_v1 = vpack.c.bf16 %v647_v58, %v646_v57  ;;  %v648_v7 = vld [vmem:[#allocation7 + $0xb0] sm:$0xff] }
  0x87   : > { %1181 = vmatpush1.bf16.msra.mxu0 %v1180_v24  ;;  %v679_v61 = vld [vmem:[#allocation7 + $0x1a8] sm:$0xff]  ;;  %v630_v2 = vld [vmem:[#allocation7 + $0x20] sm:$0xff]  ;;  %v649_v8 = vld [vmem:[#allocation7 + $0xb8] sm:$0xff] }
  0x88   : > { %1213 = vmatpush1.bf16.msra.mxu1 %v1212_v25  ;;  %1183 = vmatprep.subr.bf16.mxu0 %v1182_v26  ;;  %v631_v3 = vld [vmem:[#allocation7 + $0x28] sm:$0xff]  ;;  %v662_v4 = vld [vmem:[#allocation7 + $0x120] sm:$0xff]  ;;  %v1258_v5 = vpack.c.bf16 %v679_v61, %v678_v60  ;;  %v276_v9 = vld [vmem:[%s1739_s14 + $0x10] sm:$0xff]  ;;  %v1230_v14 = vpack.c.bf16 %v649_v8, %v648_v7 }
  0x89   : > { %1215 = vmatprep.subr.bf16.mxu1 %v1214_v30  ;;  %v663_v6 = vld [vmem:[#allocation7 + $0x128] sm:$0xff]  ;;  %v680_v10 = vld [vmem:[#allocation7 + $0x1b0] sm:$0xff]  ;;  %v681_v11 = vld [vmem:[#allocation7 + $0x1b8] sm:$0xff]  ;;  %v1228_v12 = vpack.c.bf16 %v631_v3, %v630_v2 }
  0x8a   : > { %v1260_v13 = vpack.c.bf16 %v663_v6, %v662_v4  ;;  %v632_v15 = vld [vmem:[#allocation7 + $0x30] sm:$0xff]  ;;  %v633_v16 = vld [vmem:[#allocation7 + $0x38] sm:$0xff]  ;;  %v1262_v18 = vpack.c.bf16 %v681_v11, %v680_v10  ;;  %v650_v20 = vld [vmem:[#allocation7 + $0xc0] sm:$0xff]  ;;  %v348_v11 = vlaneseq }
  0x8b   : > { %1185 = vmatpush1.bf16.msra.mxu0 %v1184_v36  ;;  %v664_v17 = vld [vmem:[#allocation7 + $0x130] sm:$0xff]  ;;  %v665_v19 = vld [vmem:[#allocation7 + $0x138] sm:$0xff]  ;;  %v651_v21 = vld [vmem:[#allocation7 + $0xc8] sm:$0xff]  ;;  %v1232_v25 = vpack.c.bf16 %v633_v16, %v632_v15 }
  0x8c   : > { %1217 = vmatpush1.bf16.msra.mxu1 %v1216_v37  ;;  %1219 = vmatprep.subr.bf16.mxu0 %v1218_v38  ;;  %v277_v22 = vld [vmem:[%s1739_s14 + $0x18] sm:$0xff]  ;;  %v682_v23 = vld [vmem:[#allocation7 + $0x1c0] sm:$0xff]  ;;  %v683_v24 = vld [vmem:[#allocation7 + $0x1c8] sm:$0xff]  ;;  %v1264_v26 = vpack.c.bf16 %v665_v19, %v664_v17  ;;  %v1234_v27 = vpack.c.bf16 %v651_v21, %v650_v20 }
  0x8d   : > { %1251 = vmatprep.subr.bf16.mxu1 %v1250_v41  ;;  %v634_v28 = vld [vmem:[#allocation7 + $0x40] sm:$0xff]  ;;  %v635_v29 = vld [vmem:[#allocation7 + $0x48] sm:$0xff]  ;;  %v1266_v31 = vpack.c.bf16 %v683_v24, %v682_v23  ;;  %v652_v33 = vld [vmem:[#allocation7 + $0xd0] sm:$0xff] }
  0x8e   : > { %433 = vmatmul.mubr.f32.vlgmr.msra.gmra.mrb[0].mxu0 %v274_v46  ;;  %v666_v30 = vld [vmem:[#allocation7 + $0x140] sm:$0xff]  ;;  %v667_v32 = vld [vmem:[#allocation7 + $0x148] sm:$0xff]  ;;  %v653_v34 = vld [vmem:[#allocation7 + $0xd8] sm:$0xff]  ;;  %v1236_v38 = vpack.c.bf16 %v635_v29, %v634_v28 }
  0x8f   : > { %546 = vmatmul.mubr.f32.vlgmr.msra.gmra.mrb[0].mxu1 %v274_v46  ;;  %438 = vmatprep.mubr.f32.mxu0 %v1521_v0  ;;  %v278_v35 = vld [vmem:[%s1739_s14 + $0x20] sm:$0xff]  ;;  %v684_v36 = vld [vmem:[#allocation7 + $0x1d0] sm:$0xff]  ;;  %v685_v37 = vld [vmem:[#allocation7 + $0x1d8] sm:$0xff]  ;;  %v1268_v39 = vpack.c.bf16 %v667_v32, %v666_v30  ;;  %v1238_v40 = vpack.c.bf16 %v653_v34, %v652_v33 }
  0x90   : > { %551 = vmatprep.mubr.f32.mxu1 %v1521_v0  ;;  %1221 = vmatpush3.bf16.msra.mxu0 %v1220_v49  ;;  %v636_v41 = vld [vmem:[#allocation7 + $0x50] sm:$0xff]  ;;  %v637_v42 = vld [vmem:[#allocation7 + $0x58] sm:$0xff]  ;;  %v1270_v44 = vpack.c.bf16 %v685_v37, %v684_v36  ;;  %v654_v46 = vld [vmem:[#allocation7 + $0xe0] sm:$0xff] }
  0x91   : > { %1253 = vmatpush3.bf16.msra.mxu1 %v1252_v50  ;;  %1223 = vmatprep.subr.bf16.mxu0 %v1222_v51  ;;  %v668_v43 = vld [vmem:[#allocation7 + $0x150] sm:$0xff]  ;;  %v669_v45 = vld [vmem:[#allocation7 + $0x158] sm:$0xff]  ;;  %v655_v47 = vld [vmem:[#allocation7 + $0xe8] sm:$0xff]  ;;  %v1240_v51 = vpack.c.bf16 %v637_v42, %v636_v41 }
  0x92   : > { %439 = vmatmul.mubr.f32.gmra.mrb[2].mxu0 %v275_v59  ;;  %1255 = vmatprep.subr.bf16.mxu1 %v1254_v55  ;;  %v279_v48 = vld [vmem:[%s1739_s14 + $0x28] sm:$0xff]  ;;  %v686_v49 = vld [vmem:[#allocation7 + $0x1e0] sm:$0xff]  ;;  %v1272_v52 = vpack.c.bf16 %v669_v45, %v668_v43  ;;  %v1242_v53 = vpack.c.bf16 %v655_v47, %v654_v46  ;;  %v280_v57 = vld [vmem:[%s1739_s14 + $0x30] sm:$0xff] }
  0x93   : > { %552 = vmatmul.mubr.f32.gmra.mrb[2].mxu1 %v275_v59  ;;  %444 = vmatprep.mubr.f32.mxu0 %v1521_v0  ;;  %v687_v50 = vld [vmem:[#allocation7 + $0x1e8] sm:$0xff]  ;;  %v638_v54 = vld [vmem:[#allocation7 + $0x60] sm:$0xff]  ;;  %v281_v59 = vld [vmem:[%s1739_s14 + $0x38] sm:$0xff] }
  0x94   : > { %557 = vmatprep.mubr.f32.mxu1 %v1521_v0  ;;  %1225 = vmatpush3.bf16.msra.mxu0 %v1224_v62  ;;  %v639_v55 = vld [vmem:[#allocation7 + $0x68] sm:$0xff]  ;;  %v1274_v56 = vpack.c.bf16 %v687_v50, %v686_v49  ;;  %v670_v60 = vld [vmem:[#allocation7 + $0x160] sm:$0xff]  ;;  %v688_v2 = vld [vmem:[#allocation7 + $0x1f0] sm:$0xff] }
  0x95   : > { %1257 = vmatpush3.bf16.msra.mxu1 %v1256_v63  ;;  %1227 = vmatprep.subr.bf16.mxu0 %v1226_v1  ;;  %v1244_v58 = vpack.c.bf16 %v639_v55, %v638_v54  ;;  %v671_v61 = vld [vmem:[#allocation7 + $0x168] sm:$0xff]  ;;  %v656_v63 = vld [vmem:[#allocation7 + $0xf0] sm:$0xff]  ;;  %v657_v1 = vld [vmem:[#allocation7 + $0xf8] sm:$0xff] }
  0x96   : > { %445 = vmatmul.mubr.f32.gmra.mrb[4].mxu0 %v276_v9  ;;  %1259 = vmatprep.subr.bf16.mxu1 %v1258_v5  ;;  %v1276_v62 = vpack.c.bf16 %v671_v61, %v670_v60  ;;  %v1246_v3 = vpack.c.bf16 %v657_v1, %v656_v63  ;;  %v640_v4 = vld [vmem:[#allocation7 + $0x70] sm:$0xff]  ;;  %v641_v5 = vld [vmem:[#allocation7 + $0x78] sm:$0xff] }
  0x97   : > { %558 = vmatmul.mubr.f32.gmra.mrb[4].mxu1 %v276_v9  ;;  %450 = vmatprep.mubr.f32.mxu0 %v1521_v0  ;;  %v689_v6 = vld [vmem:[#allocation7 + $0x1f8] sm:$0xff]  ;;  %v1248_v7 = vpack.c.bf16 %v641_v5, %v640_v4  ;;  %v672_v9 = vld [vmem:[#allocation7 + $0x170] sm:$0xff] }
  0x98   : > { %563 = vmatprep.mubr.f32.mxu1 %v1521_v0  ;;  %1229 = vmatpush3.bf16.msra.mxu0 %v1228_v12  ;;  %v1278_v8 = vpack.c.bf16 %v689_v6, %v688_v2  ;;  %v673_v10 = vld [vmem:[#allocation7 + $0x178] sm:$0xff]  ;;  %v349_v12 = vshrl.u32 %v348_v11, 7 }
  0x99   : > { %1261 = vmatpush3.bf16.msra.mxu1 %v1260_v13  ;;  %1231 = vmatprep.subr.bf16.mxu0 %v1230_v14  ;;  %v346_v14 = vld [vmem:[%s1894_s2] sm:$0xf] }
  0x9a   : > { %451 = vmatmul.mubr.f32.gmra.mrb[6].mxu0 %v277_v22  ;;  %1263 = vmatprep.subr.bf16.mxu1 %v1262_v18  ;;  %v350_v13 = vsub.s32 0, %v349_v12  ;;  %v358_v15 = vsub.s32 2, %v349_v12  ;;  %v354_v16 = vsub.s32 1, %v349_v12  ;;  %v362_v17 = vsub.s32 3, %v349_v12 }
  0x9b   : > { %564 = vmatmul.mubr.f32.gmra.mrb[6].mxu1 %v277_v22  ;;  %456 = vmatprep.mubr.f32.mxu0 %v1521_v0 }
  0x9c   : > { %569 = vmatprep.mubr.f32.mxu1 %v1521_v0  ;;  %1233 = vmatpush3.bf16.msra.mxu0 %v1232_v25  ;;  %v1776_v18 = vrot.slane %v346_v14, %v350_v13  ;;  %v1778_v19 = vrot.slane %v346_v14, %v358_v15  ;;  %v1780_v20 = vrot.slane %v346_v14, %v354_v16 }
  0x9d   : > { %1265 = vmatpush3.bf16.msra.mxu1 %v1264_v26  ;;  %1235 = vmatprep.subr.bf16.mxu0 %v1234_v27  ;;  %v1782_v21 = vrot.slane %v346_v14, %v362_v17 }
  0x9e   : > { %457 = vmatmul.mubr.f32.gmra.mrb[8].mxu0 %v278_v35  ;;  %1267 = vmatprep.subr.bf16.mxu1 %v1266_v31 }
  0x9f   : > { %570 = vmatmul.mubr.f32.gmra.mrb[8].mxu1 %v278_v35  ;;  %462 = vmatprep.mubr.f32.mxu0 %v1521_v0 }
  0xa0   : > { %575 = vmatprep.mubr.f32.mxu1 %v1521_v0  ;;  %1237 = vmatpush3.bf16.msra.mxu0 %v1236_v38 }
  0xa1   : > { %1269 = vmatpush3.bf16.msra.mxu1 %v1268_v39  ;;  %1239 = vmatprep.subr.bf16.mxu0 %v1238_v40 }
  0xa2   : > { %463 = vmatmul.mubr.f32.gmra.mrb[10].mxu0 %v279_v48  ;;  %1271 = vmatprep.subr.bf16.mxu1 %v1270_v44 }
  0xa3   : > { %576 = vmatmul.mubr.f32.gmra.mrb[10].mxu1 %v279_v48  ;;  %468 = vmatprep.mubr.f32.mxu0 %v1521_v0 }
  0xa4   : > { %581 = vmatprep.mubr.f32.mxu1 %v1521_v0  ;;  %1241 = vmatpush3.bf16.msra.mxu0 %v1240_v51 }
  0xa5   : > { %1273 = vmatpush3.bf16.msra.mxu1 %v1272_v52  ;;  %1243 = vmatprep.subr.bf16.mxu0 %v1242_v53 }
  0xa6   : > { %469 = vmatmul.mubr.f32.gmra.mrb[12].mxu0 %v280_v57  ;;  %1275 = vmatprep.subr.bf16.mxu1 %v1274_v56 }
  0xa7   : > { %582 = vmatmul.mubr.f32.gmra.mrb[12].mxu1 %v280_v57  ;;  %474 = vmatprep.mubr.f32.mxu0 %v1521_v0 }
  0xa8   : > { %587 = vmatprep.mubr.f32.mxu1 %v1521_v0  ;;  %1245 = vmatpush3.bf16.msra.mxu0 %v1244_v58  ;;  %v1280_v0 = vpack.c.bf16 %v673_v10, %v672_v9 }
  0xa9   : > { %1277 = vmatpush3.bf16.msra.mxu1 %v1276_v62  ;;  %1247 = vmatprep.subr.bf16.mxu0 %v1246_v3 }
  0xaa   : > { %475 = vmatmul.mubr.f32.gmra.mrb[14].mxu0 %v281_v59  ;;  %1279 = vmatprep.subr.bf16.mxu1 %v1278_v8 }
  0xab   : > { %588 = vmatmul.mubr.f32.gmra.mrb[14].mxu1 %v281_v59 }
  0xac   : > { %1249 = vmatpush3.bf16.msra.mxu0 %v1248_v7 }
  0xad   : > { %1281 = vmatpush3.bf16.msra.mxu1 %v1280_v0 }
 0x161   : > { %v434_v22 = vpop.f32.mrb[0].mxu0 }
 0x162   : > { %v435_v23 = vadd.f32 %v434_v22, %v1776_v18  ;;  %v547_v24 = vpop.f32.mrb[0].mxu1  ;;  %v436_v25 = vpop.f32.mrb[1].mxu0 }
 0x163   : > { %v548_v26 = vadd.f32 %v547_v24, %v1778_v19  ;;  %v437_v27 = vadd.f32 %v436_v25, %v1780_v20  ;;  %v549_v28 = vpop.f32.mrb[1].mxu1 }
 0x164   : > { %v550_v29 = vadd.f32 %v549_v28, %v1782_v21  ;;  %v594_v33 = vmax.f32 %v435_v23, 0.0 }
 0x165   : > { %v596_v30 = vmax.f32 %v548_v26, 0.0  ;;  %v595_v31 = vmax.f32 %v437_v27, 0.0  ;;  %v440_v32 = vpop.f32.mrb[2].mxu0 }
 0x166   : > { %v597_v34 = vmax.f32 %v550_v29, 0.0  ;;  %v441_v35 = vadd.f32 %v440_v32, %v1776_v18  ;;  %v553_v36 = vpop.f32.mrb[2].mxu1  ;;  %v442_v37 = vpop.f32.mrb[3].mxu0 }
 0x167   : > { %v554_v38 = vadd.f32 %v553_v36, %v1778_v19  ;;  %v443_v39 = vadd.f32 %v442_v37, %v1780_v20  ;;  %v555_v40 = vpop.f32.mrb[3].mxu1  ;;  %761 = vmatprep.mubr.f32.mxu0 %v595_v31 }
 0x168   : > { %v556_v41 = vadd.f32 %v555_v40, %v1782_v21  ;;  %866 = vmatprep.mubr.f32.mxu1 %v597_v34  ;;  %762 = vmatmul.mubr.f32.vlgmr.msra.gmra.mrb[16].mxu0 %v594_v33  ;;  %v598_v45 = vmax.f32 %v441_v35, 0.0 }
 0x169   : > { %v600_v42 = vmax.f32 %v554_v38, 0.0  ;;  %v599_v43 = vmax.f32 %v443_v39, 0.0  ;;  %867 = vmatmul.mubr.f32.vlgmr.msra.gmra.mrb[16].mxu1 %v596_v30  ;;  %v446_v44 = vpop.f32.mrb[4].mxu0 }
 0x16a   : > { %v601_v46 = vmax.f32 %v556_v41, 0.0  ;;  %v447_v47 = vadd.f32 %v446_v44, %v1776_v18  ;;  %v559_v48 = vpop.f32.mrb[4].mxu1  ;;  %v448_v49 = vpop.f32.mrb[5].mxu0 }
 0x16b   : > { %v560_v50 = vadd.f32 %v559_v48, %v1778_v19  ;;  %v449_v51 = vadd.f32 %v448_v49, %v1780_v20  ;;  %v561_v52 = vpop.f32.mrb[5].mxu1  ;;  %766 = vmatprep.mubr.f32.mxu0 %v599_v43 }
 0x16c   : > { %v562_v53 = vadd.f32 %v561_v52, %v1782_v21  ;;  %871 = vmatprep.mubr.f32.mxu1 %v601_v46  ;;  %767 = vmatmul.mubr.f32.gmra.mrb[18].mxu0 %v598_v45  ;;  %v602_v57 = vmax.f32 %v447_v47, 0.0 }
 0x16d   : > { %v604_v54 = vmax.f32 %v560_v50, 0.0  ;;  %v603_v55 = vmax.f32 %v449_v51, 0.0  ;;  %872 = vmatmul.mubr.f32.gmra.mrb[18].mxu1 %v600_v42  ;;  %v452_v56 = vpop.f32.mrb[6].mxu0 }
 0x16e   : > { %v605_v58 = vmax.f32 %v562_v53, 0.0  ;;  %v453_v59 = vadd.f32 %v452_v56, %v1776_v18  ;;  %v565_v60 = vpop.f32.mrb[6].mxu1  ;;  %v454_v61 = vpop.f32.mrb[7].mxu0 }
 0x16f   : > { %v566_v62 = vadd.f32 %v565_v60, %v1778_v19  ;;  %v455_v63 = vadd.f32 %v454_v61, %v1780_v20  ;;  %v567_v1 = vpop.f32.mrb[7].mxu1  ;;  %771 = vmatprep.mubr.f32.mxu0 %v603_v55 }
 0x170   : > { %v568_v2 = vadd.f32 %v567_v1, %v1782_v21  ;;  %876 = vmatprep.mubr.f32.mxu1 %v605_v58  ;;  %772 = vmatmul.mubr.f32.gmra.mrb[20].mxu0 %v602_v57  ;;  %v606_v6 = vmax.f32 %v453_v59, 0.0 }
 0x171   : > { %v608_v3 = vmax.f32 %v566_v62, 0.0  ;;  %v607_v4 = vmax.f32 %v455_v63, 0.0  ;;  %877 = vmatmul.mubr.f32.gmra.mrb[20].mxu1 %v604_v54  ;;  %v458_v5 = vpop.f32.mrb[8].mxu0 }
 0x172   : > { %v609_v7 = vmax.f32 %v568_v2, 0.0  ;;  %v459_v8 = vadd.f32 %v458_v5, %v1776_v18  ;;  %v571_v9 = vpop.f32.mrb[8].mxu1  ;;  %v460_v10 = vpop.f32.mrb[9].mxu0 }
 0x173   : > { %v572_v0 = vadd.f32 %v571_v9, %v1778_v19  ;;  %v461_v11 = vadd.f32 %v460_v10, %v1780_v20  ;;  %v573_v12 = vpop.f32.mrb[9].mxu1  ;;  %776 = vmatprep.mubr.f32.mxu0 %v607_v4 }
 0x174   : > { %v574_v13 = vadd.f32 %v573_v12, %v1782_v21  ;;  %881 = vmatprep.mubr.f32.mxu1 %v609_v7  ;;  %777 = vmatmul.mubr.f32.gmra.mrb[22].mxu0 %v606_v6  ;;  %v610_v17 = vmax.f32 %v459_v8, 0.0 }
 0x175   : > { %v612_v14 = vmax.f32 %v572_v0, 0.0  ;;  %v611_v15 = vmax.f32 %v461_v11, 0.0  ;;  %882 = vmatmul.mubr.f32.gmra.mrb[22].mxu1 %v608_v3  ;;  %v464_v16 = vpop.f32.mrb[10].mxu0 }
 0x176   : > { %v613_v22 = vmax.f32 %v574_v13, 0.0  ;;  %v465_v23 = vadd.f32 %v464_v16, %v1776_v18  ;;  %v577_v24 = vpop.f32.mrb[10].mxu1  ;;  %v466_v25 = vpop.f32.mrb[11].mxu0 }
 0x177   : > { %v578_v26 = vadd.f32 %v577_v24, %v1778_v19  ;;  %v467_v27 = vadd.f32 %v466_v25, %v1780_v20  ;;  %v579_v28 = vpop.f32.mrb[11].mxu1  ;;  %781 = vmatprep.mubr.f32.mxu0 %v611_v15 }
 0x178   : > { %v580_v29 = vadd.f32 %v579_v28, %v1782_v21  ;;  %886 = vmatprep.mubr.f32.mxu1 %v613_v22  ;;  %782 = vmatmul.mubr.f32.gmra.mrb[24].mxu0 %v610_v17  ;;  %v614_v33 = vmax.f32 %v465_v23, 0.0 }
 0x179   : > { %v616_v30 = vmax.f32 %v578_v26, 0.0  ;;  %v615_v31 = vmax.f32 %v467_v27, 0.0  ;;  %887 = vmatmul.mubr.f32.gmra.mrb[24].mxu1 %v612_v14  ;;  %v470_v32 = vpop.f32.mrb[12].mxu0 }
 0x17a   : > { %v617_v34 = vmax.f32 %v580_v29, 0.0  ;;  %v471_v35 = vadd.f32 %v470_v32, %v1776_v18  ;;  %v583_v36 = vpop.f32.mrb[12].mxu1  ;;  %v472_v37 = vpop.f32.mrb[13].mxu0 }
 0x17b   : > { %v584_v38 = vadd.f32 %v583_v36, %v1778_v19  ;;  %v473_v39 = vadd.f32 %v472_v37, %v1780_v20  ;;  %v585_v40 = vpop.f32.mrb[13].mxu1  ;;  %786 = vmatprep.mubr.f32.mxu0 %v615_v31 }
 0x17c   : > { %v586_v41 = vadd.f32 %v585_v40, %v1782_v21  ;;  %891 = vmatprep.mubr.f32.mxu1 %v617_v34  ;;  %787 = vmatmul.mubr.f32.gmra.mrb[26].mxu0 %v614_v33  ;;  %v618_v45 = vmax.f32 %v471_v35, 0.0 }
 0x17d   : > { %v620_v42 = vmax.f32 %v584_v38, 0.0  ;;  %v619_v43 = vmax.f32 %v473_v39, 0.0  ;;  %892 = vmatmul.mubr.f32.gmra.mrb[26].mxu1 %v616_v30  ;;  %v476_v44 = vpop.f32.mrb[14].mxu0 }
 0x17e   : > { %v621_v46 = vmax.f32 %v586_v41, 0.0  ;;  %v477_v47 = vadd.f32 %v476_v44, %v1776_v18  ;;  %v589_v48 = vpop.f32.mrb[14].mxu1  ;;  %v478_v49 = vpop.f32.mrb[15].mxu0 }
 0x17f   : > { %v590_v50 = vadd.f32 %v589_v48, %v1778_v19  ;;  %v479_v51 = vadd.f32 %v478_v49, %v1780_v20  ;;  %v591_v52 = vpop.f32.mrb[15].mxu1  ;;  %791 = vmatprep.mubr.f32.mxu0 %v619_v43  ;;  %v1819_v20 = vld [vmem:[%s1896_s4] ss:$0 sm:$0xff] }
 0x180   : > { %v592_v53 = vadd.f32 %v591_v52, %v1782_v21  ;;  %896 = vmatprep.mubr.f32.mxu1 %v621_v46  ;;  %792 = vmatmul.mubr.f32.gmra.mrb[28].mxu0 %v618_v45  ;;  %v622_v56 = vmax.f32 %v477_v47, 0.0 }
 0x181   : > { %v624_v54 = vmax.f32 %v590_v50, 0.0  ;;  %v623_v55 = vmax.f32 %v479_v51, 0.0  ;;  %897 = vmatmul.mubr.f32.gmra.mrb[28].mxu1 %v620_v42 }
 0x182   : > { %v625_v57 = vmax.f32 %v592_v53, 0.0 }
 0x183   : > { %796 = vmatprep.mubr.f32.mxu0 %v623_v55 }
 0x184   : > { %901 = vmatprep.mubr.f32.mxu1 %v625_v57  ;;  %797 = vmatmul.mubr.f32.gmra.mrb[30].mxu0 %v622_v56 }
 0x185   : > { %902 = vmatmul.mubr.f32.gmra.mrb[30].mxu1 %v624_v54 }
 0x23b   : > { %v1074_v18 = vpop.f32.mrb[16].mxu0 }
 0x23c   : > { %v1130_v19 = vpop.f32.mrb[16].mxu1  ;;  %v1075_v21 = vpop.f32.mrb[17].mxu0 }
 0x23d   : > { %v1076_v58 = vadd.f32 %v1075_v21, %v1074_v18  ;;  %v1131_v59 = vpop.f32.mrb[17].mxu1 }
 0x23e   : > { %v1132_v60 = vadd.f32 %v1131_v59, %v1130_v19 }
 0x23f   : > { %v764_v61 = vadd.f32 %v1076_v58, %v1819_v20  ;;  %v1077_v62 = vpop.f32.mrb[18].mxu0 }
 0x240   : > { %v1133_v63 = vpop.f32.mrb[18].mxu1  ;;  %v1078_v1 = vpop.f32.mrb[19].mxu0 }
 0x241   : > { %v869_v2 = vadd.f32 %v1132_v60, %v764_v61  ;;  %v1079_v3 = vadd.f32 %v1078_v1, %v1077_v62  ;;  %v1134_v4 = vpop.f32.mrb[19].mxu1 }
 0x242   : > { %v1135_v5 = vadd.f32 %v1134_v4, %v1133_v63 }
 0x243   : > { %907 = vst [vmem:[%s1824_s10] sm:$0xff] %v869_v2  ;;  %v769_v6 = vadd.f32 %v1079_v3, %v1819_v20  ;;  %v1080_v7 = vpop.f32.mrb[20].mxu0 }
 0x244   : > { %v1136_v8 = vpop.f32.mrb[20].mxu1  ;;  %v1081_v9 = vpop.f32.mrb[21].mxu0 }
 0x245   : > { %v874_v10 = vadd.f32 %v1135_v5, %v769_v6  ;;  %v1082_v0 = vadd.f32 %v1081_v9, %v1080_v7  ;;  %v1137_v11 = vpop.f32.mrb[21].mxu1 }
 0x246   : > { %v1138_v12 = vadd.f32 %v1137_v11, %v1136_v8 }
 0x247   : > { %908 = vst [vmem:[%s1824_s10 + $0x8] sm:$0xff] %v874_v10  ;;  %v774_v13 = vadd.f32 %v1082_v0, %v1819_v20  ;;  %v1083_v14 = vpop.f32.mrb[22].mxu0 }
 0x248   : > { %v1139_v15 = vpop.f32.mrb[22].mxu1  ;;  %v1084_v16 = vpop.f32.mrb[23].mxu0 }
 0x249   : > { %v879_v17 = vadd.f32 %v1138_v12, %v774_v13  ;;  %v1085_v22 = vadd.f32 %v1084_v16, %v1083_v14  ;;  %v1140_v23 = vpop.f32.mrb[23].mxu1 }
 0x24a   : > { %v1141_v24 = vadd.f32 %v1140_v23, %v1139_v15 }
 0x24b   : > { %909 = vst [vmem:[%s1824_s10 + $0x10] sm:$0xff] %v879_v17  ;;  %v779_v25 = vadd.f32 %v1085_v22, %v1819_v20  ;;  %v1086_v26 = vpop.f32.mrb[24].mxu0 }
 0x24c   : > { %v1142_v27 = vpop.f32.mrb[24].mxu1  ;;  %v1087_v28 = vpop.f32.mrb[25].mxu0 }
 0x24d   : > { %v884_v29 = vadd.f32 %v1141_v24, %v779_v25  ;;  %v1088_v30 = vadd.f32 %v1087_v28, %v1086_v26  ;;  %v1143_v31 = vpop.f32.mrb[25].mxu1 }
 0x24e   : > { %v1144_v32 = vadd.f32 %v1143_v31, %v1142_v27 }
 0x24f   : > { %910 = vst [vmem:[%s1824_s10 + $0x18] sm:$0xff] %v884_v29  ;;  %v784_v33 = vadd.f32 %v1088_v30, %v1819_v20  ;;  %v1089_v34 = vpop.f32.mrb[26].mxu0 }
 0x250   : > { %v1145_v35 = vpop.f32.mrb[26].mxu1  ;;  %v1090_v36 = vpop.f32.mrb[27].mxu0 }
 0x251   : > { %v889_v37 = vadd.f32 %v1144_v32, %v784_v33  ;;  %v1091_v38 = vadd.f32 %v1090_v36, %v1089_v34  ;;  %v1146_v39 = vpop.f32.mrb[27].mxu1 }
 0x252   : > { %v1147_v40 = vadd.f32 %v1146_v39, %v1145_v35 }
 0x253   : > { %911 = vst [vmem:[%s1824_s10 + $0x20] sm:$0xff] %v889_v37  ;;  %v789_v41 = vadd.f32 %v1091_v38, %v1819_v20  ;;  %v1092_v42 = vpop.f32.mrb[28].mxu0 }
 0x254   : > { %v1148_v43 = vpop.f32.mrb[28].mxu1  ;;  %v1093_v44 = vpop.f32.mrb[29].mxu0 }
 0x255   : > { %v894_v45 = vadd.f32 %v1147_v40, %v789_v41  ;;  %v1094_v46 = vadd.f32 %v1093_v44, %v1092_v42  ;;  %v1149_v47 = vpop.f32.mrb[29].mxu1 }
 0x256   : > { %v1150_v48 = vadd.f32 %v1149_v47, %v1148_v43 }
 0x257   : > { %912 = vst [vmem:[%s1824_s10 + $0x28] sm:$0xff] %v894_v45  ;;  %v794_v49 = vadd.f32 %v1094_v46, %v1819_v20  ;;  %v1095_v50 = vpop.f32.mrb[30].mxu0 }
 0x258   : > { %v1151_v51 = vpop.f32.mrb[30].mxu1  ;;  %v1096_v52 = vpop.f32.mrb[31].mxu0 }
 0x259   : > { %v899_v53 = vadd.f32 %v1150_v48, %v794_v49  ;;  %v1097_v54 = vadd.f32 %v1096_v52, %v1095_v50  ;;  %v1152_v55 = vpop.f32.mrb[31].mxu1 }
 0x25a   : > { %v1153_v56 = vadd.f32 %v1152_v55, %v1151_v51 }
 0x25b   : > { %913 = vst [vmem:[%s1824_s10 + $0x30] sm:$0xff] %v899_v53  ;;  %v799_v57 = vadd.f32 %v1097_v54, %v1819_v20 }
 0x25d   : > { %v904_v18 = vadd.f32 %v1153_v56, %v799_v57 }
 0x25f   : > { %914 = vst [vmem:[%s1824_s10 + $0x38] sm:$0xff] %v904_v18 }
 0x260   : > { %1455 = shalt.err (!%p1452_p2)
}
 0x261   : > { %s1456_s14 = scalar_lea.hbm %s1847_s11, 1024  ;;  %s1460_s12 = scalar_lea.hbm %s1897_s5, 2048 }
 0x262   : > { %p1457_p13 = scmp.ne.s32.totalorder %s1847_s11, %s1456_s14  ;;  %p1461_p4 = scmp.lt.u32.totalorder %s1847_s11, %s1897_s5 }
 0x263   : > { %p1462_p7 = scmp.lt.u32.totalorder %s1460_s12, %s1456_s14  ;;  %p1464_p11 = scmp.lt.u32.totalorder %s1456_s14, %s1847_s11 }
 0x264   : > { %p1458_p6 = pnand %p1457_p13, %p1911_p0 }
 0x265   : > { %p1463_p8 = por %p1462_p7, %p1461_p4 }
 0x266   : > { %p1459_p10 = pneg %p1458_p6 }
 0x267   : > { %p1465_p1 = por %p1464_p11, %p1463_p8 }
 0x269   : > { %p1466_p3 = pnand %p1465_p1, %p1459_p10 }
 0x26b   : > { %1469 = shalt.err (!%p1466_p3)
}
 0x26c   : > { %s1523_s15 = smov 128   ;;  %s1524_s9 = smov 8  }
 0x26d   : > { %1292 = dma.vmem_to_hbm [thread:$0]  (%p1911_p0), %s1840_s28, 1024, %s1847_s11, %s916_s23, %s1523_s15, %s1523_s15, %s1524_s9  }
 0x26e PF: > { %s944_s30 = sand.u32 1, %s1500_s18   ;;  %p1912_p5 = scmp.ne.s32.totalorder %s1902_s25, 0 }
 0x26f   : > { %p1913_p9 = scmp.ge.s32.totalorder %s1512_s21, 2  ;;  %s945_s7 = scalar_lea.sflag [#allocation4], %s944_s30 }
 0x271   : > { %p1306_p12 = pnand %p1913_p9, %p1912_p5 }
 0x273   : > { %1495 = dma.done.wait (!%p1306_p12), %s945_s7, 1024  }
 0x274   : > { %1497 = vsyncadd (!%p1306_p12), %s945_s7, 4294966272  ;;  %p19_p2 = scmp.ge.s32.totalorder %s1668_s16, 4   ;;  %s1914_s18 = smov %s1504_s19 }
 0x275   : > { %s1915_s19 = smov %s1508_s20  ;;  %s1916_s20 = smov %s1677_s27 }
 0x276   : > { %s1917_s21 = smov %s1668_s16  ;;  %21 = sbr.rel (!%p19_p2) target bundleno = 6 (0x6), region = 93 }
 0x27d   :  { %950 = vsyncpa [#allocation3], 1 }
 0x27e   :  { %952 = vsyncpa [#allocation3 + $0x1], 1 }
 0x27f   :  { %953 = vsyncpa [#allocation6], 1 }
 0x280   :  { %954 = vsyncpa [#allocation4], 1 }
 0x281   :  { %956 = vsyncpa [#allocation4 + $0x1], 1 }

</bundles_post_ra>
